<compile_context>
chip_gen: v7x
topology: tpu7x:2x2x1
jax: 0.10.0
libtpu: 0.0.40
codegen_flags: <defaults>
</compile_context>

<pallas_src>
import functools

import jax
import jax.numpy as jnp
from jax import lax
from jax.experimental import pallas as pl
from jax.experimental.pallas import tpu as pltpu

NEG_SLOPE = 0.01        # LeakyReLU ('lrelu')
SUBLANE_PAD = 16        # contraction-dim padding granule for bf16 operands


def _lrelu(x):
    # max(x, 0.01*x) == LeakyReLU(0.01) for x in R; 2 VALU ops.
    return jnp.maximum(x, NEG_SLOPE * x)


def _round_up(n, m):
    return ((n + m - 1) // m) * m


# ----------------------------- fused Pallas kernel ---------------------------
def _fused_tcn_kernel(*refs, configs, tlen):
    """All DilationBlocks on one batch element's lane-dense (C, T) tile.

    refs = (x_ref, w_l0_conv0, w_l0_conv1, ..., w_lN_conv0, w_lN_conv1, out_ref)

    x_ref:   (1, cin0, tlen) f32
    w*_ref:  bf16 k-major flattened conv weights; bias folded into an extra
             column (matched by a ones row in the im2col operand); contraction
             dim zero-padded to a multiple of SUBLANE_PAD.  conv0's weight
             additionally carries the 1x1 downsample rows (residual path).
    out_ref: (1, cout_last, tlen) f32
    """
    x_ref = refs[0]
    out_ref = refs[-1]
    w_refs = refs[1:-1]

    # Time index of every lane (hoisted once; per-batch tile => local == global).
    t_idx = lax.broadcasted_iota(jnp.int32, (1, tlen), 1)

    def im2col(val, shifts, valids, kdim):
        """(nch, T) f32 -> (kdim, T) bf16: K shifted views + ones/zero rows."""
        nch = val.shape[0]
        views = []
        for s, valid in zip(shifts, valids):
            if s == 0:                                   # centre tap
                views.append(val)
            else:
                # out[t] = val[t + s]; wrapped lanes are masked to zero below.
                rolled = pltpu.roll(val, shift=(-s) % tlen, axis=1)
                views.append(jnp.where(valid, rolled, 0.0))
        extra = kdim - len(shifts) * nch                 # >=1: bias row + pad
        row = lax.broadcasted_iota(jnp.int32, (extra, tlen), 0)
        views.append((row == 0).astype(jnp.float32))     # ones row (bias), zeros pad
        return jnp.concatenate(views, axis=0).astype(jnp.bfloat16)

    cur = x_ref[0].astype(jnp.float32)                   # (cin0, T), in registers

    for li, cfg in enumerate(configs):
        w0f_ref = w_refs[2 * li]
        w1_ref = w_refs[2 * li + 1]
        cint, ktaps, dil, pad = cfg["cint"], cfg["ktaps"], cfg["dil"], cfg["pad"]

        shifts = [k * dil - pad for k in range(ktaps)]
        valids = [None if s == 0 else
                  jnp.logical_and(t_idx >= -s, t_idx < tlen - s)
                  for s in shifts]

        # ---- conv0 (+ fused 1x1 residual conv + bias): one MXU push ----
        cols0 = im2col(cur, shifts, valids, cfg["kdim0"])
        z0 = jnp.dot(w0f_ref[...], cols0, preferred_element_type=jnp.float32)
        if cfg["has_downsample"]:
            h = _lrelu(z0[:cint])
            res = z0[cint:]                              # downsample(x) + bias
        else:
            h = _lrelu(z0)
            res = cur                                    # identity residual (f32)
        # TODO(synk): nn.Dropout1d is identity in eval mode; training-time
        # channel dropout is not implemented here.

        # ---- conv1 (+ bias): second MXU push.  The LeakyReLU between conv1's
        # output and the residual add prevents folding the residual here. ----
        cols1 = im2col(h, shifts, valids, cfg["kdim1"])
        o = _lrelu(jnp.dot(w1_ref[...], cols1, preferred_element_type=jnp.float32))

        cur = _lrelu(o + res)

    out_ref[0] = cur.astype(out_ref.dtype)


# ----------------------------- full TCN forward ------------------------------
def make_tcn_forward(configs):
    cout_last = configs[-1]["cout"]

    def fwd(x_bts, weights):
        b, t, f = x_bts.shape
        x_bct = jnp.transpose(x_bts, (0, 2, 1))                    # (B, C, T)
        flat_w = [w for layer_w in weights for w in layer_w]
        kern = functools.partial(_fused_tcn_kernel, configs=configs, tlen=t)
        in_specs = [pl.BlockSpec((1, f, t), lambda i: (i, 0, 0))]
        # Constant index maps: tiny weights fetched once, resident across steps.
        in_specs += [pl.BlockSpec(w.shape, lambda i: (0, 0)) for w in flat_w]
        out = pl.pallas_call(
            kern,
            out_shape=jax.ShapeDtypeStruct((b, cout_last, t), jnp.float32),
            grid=(b,),
            in_specs=in_specs,
            out_specs=pl.BlockSpec((1, cout_last, t), lambda i: (i, 0, 0)),
            # TODO(synk): for sequences too long for VMEM, add a second grid
            # axis tiling time (tile width a multiple of 128 lanes plus a
            # receptive-field halo of sum_l num_lags*2**l per side, recompute
            # in the halo), sized against 64 MiB VMEM on v7x vs 128 MiB on
            # v5e/v6e, and consider pipeline_mode=pl.Buffered(3) on x if DMA
            # is exposed.
            compiler_params=pltpu.CompilerParams(
                dimension_semantics=("parallel",)),
        )(x_bct, *flat_w)
        return jnp.transpose(out, (0, 2, 1))                       # (B, T, H)

    return jax.jit(fwd)


# ----------------------- deterministic parameter setup -----------------------
def make_weight_norm_conv(key, out_c, in_c, k):
    """weight_norm(Conv1d) right after init reproduces the underlying weight."""
    kv, kb = jax.random.split(key)
    w = 0.01 * jax.random.normal(kv, (out_c, in_c, k), jnp.float32)
    b = 0.05 * jax.random.normal(kb, (out_c, 1), jnp.float32)
    return w, b


def make_downsample(key, out_c, in_c):
    kv, kb = jax.random.split(key)
    w = 0.01 * jax.random.normal(kv, (out_c, in_c), jnp.float32)
    b = 0.05 * jax.random.normal(kb, (out_c, 1), jnp.float32)
    return w, b


def prepare_layer(key, in_size, int_size, out_size, num_lags, dilation):
    """Kernel-layout (bf16, bias-folded, padded) + reference-layout params."""
    ktaps = 2 * num_lags + 1
    pad = num_lags * dilation
    k0, k1, kd = jax.random.split(key, 3)
    w0, b0 = make_weight_norm_conv(k0, int_size, in_size, ktaps)
    w1, b1 = make_weight_norm_conv(k1, out_size, int_size, ktaps)
    has_ds = in_size != out_size
    wd, bd = make_downsample(kd, out_size, in_size) if has_ds else (None, None)

    bias_col0 = ktaps * in_size
    bias_col1 = ktaps * int_size
    kdim0 = _round_up(bias_col0 + 1, SUBLANE_PAD)
    kdim1 = _round_up(bias_col1 + 1, SUBLANE_PAD)

    # conv0: k-major flatten, bias column, zero-padded contraction dim,
    # 1x1 downsample rows appended (nonzero only in the centre-tap block).
    rows0 = int_size + (out_size if has_ds else 0)
    w0_2d = jnp.transpose(w0, (0, 2, 1)).reshape(int_size, bias_col0)
    w0f = jnp.zeros((rows0, kdim0), jnp.float32)
    w0f = w0f.at[:int_size, :bias_col0].set(w0_2d)
    w0f = w0f.at[:int_size, bias_col0].set(b0[:, 0])
    if has_ds:
        centre = num_lags * in_size
        w0f = w0f.at[int_size:, centre:centre + in_size].set(wd)
        w0f = w0f.at[int_size:, bias_col0].set(bd[:, 0])

    w1_2d = jnp.transpose(w1, (0, 2, 1)).reshape(out_size, bias_col1)
    w1f = jnp.zeros((out_size, kdim1), jnp.float32)
    w1f = w1f.at[:, :bias_col1].set(w1_2d)
    w1f = w1f.at[:, bias_col1].set(b1[:, 0])

    cfg = dict(cin=in_size, cint=int_size, cout=out_size, ktaps=ktaps,
               dil=dilation, pad=pad, kdim0=kdim0, kdim1=kdim1,
               has_downsample=has_ds)
    kernel_w = (w0f.astype(jnp.bfloat16), w1f.astype(jnp.bfloat16))
    ref_w = (w0, b0, w1, b1, wd, bd, dilation, pad)
    return cfg, kernel_w, ref_w


# ----------------------------- pure-JAX reference ----------------------------
def _block_reference(x_nct, w0, b0, w1, b1, wd, bd, dil, pad):
    dn = ("NCH", "OIH", "NCH")

    def conv(inp, w, b):
        y = lax.conv_general_dilated(inp, w, window_strides=(1,),
                                     padding=[(pad, pad)], rhs_dilation=(dil,),
                                     dimension_numbers=dn)
        return y + b[None, :, :]

    h = _lrelu(conv(x_nct, w0, b0))
    o = _lrelu(conv(h, w1, b1))
    if wd is None:
        res = x_nct
    else:
        res = jnp.einsum("oc,bct->bot", wd, x_nct) + bd[None, :, :]
    return _lrelu(o + res)


def reference_tcn(x_bts, ref_layers):
    x = jnp.transpose(x_bts, (0, 2, 1))                      # (B, C, T)
    for (w0, b0, w1, b1, wd, bd, dil, pad) in ref_layers:
        x = _block_reference(x, w0, b0, w1, b1, wd, bd, dil, pad)
    return jnp.transpose(x, (0, 2, 1))                       # (B, T, H)


# ------------------------------------ main -----------------------------------
if __name__ == "__main__":
    BATCH, SEQ = 4, 128          # per-batch (C, 128) lane-dense tiles, grid=(4,)
    INPUT_SIZE, NUM_HID, NUM_LAYERS, NUM_LAGS = 4, 16, 3, 1

    key = jax.random.PRNGKey(0)
    kx, kp = jax.random.split(key)
    x = jax.random.normal(kx, (BATCH, SEQ, INPUT_SIZE), jnp.float32)

    configs, params, ref_params = [], [], []
    for i, lk in enumerate(jax.random.split(kp, NUM_LAYERS)):
        cfg, p, rp = prepare_layer(
            lk, INPUT_SIZE if i == 0 else NUM_HID, NUM_HID, NUM_HID,
            NUM_LAGS, 2 ** i)
        configs.append(cfg)
        params.append(p)
        ref_params.append(rp)

    fwd = make_tcn_forward(configs)
    out = jax.block_until_ready(fwd(x, tuple(params)))

    ref = reference_tcn(x, ref_params)
    assert out.shape == (BATCH, SEQ, NUM_HID)
    err = jnp.max(jnp.abs(out - ref))
    # bf16 MXU operands vs f32 reference -> loosened tolerance.
    assert jnp.allclose(out, ref, rtol=3e-2, atol=5e-3), f"max abs err {err}"

    print("KERNEL_OK")
</pallas_src>

<mosaic_0001>
module attributes {stable_mosaic.version = 11 : i64} {
  func.func @_fused_tcn_kernel(%arg0: i32, %arg1: memref<1x4x128xf32, #tpu.memory_space<vmem>>, %arg2: memref<32x16xbf16, #tpu.memory_space<vmem>>, %arg3: memref<16x64xbf16, #tpu.memory_space<vmem>>, %arg4: memref<16x64xbf16, #tpu.memory_space<vmem>>, %arg5: memref<16x64xbf16, #tpu.memory_space<vmem>>, %arg6: memref<16x64xbf16, #tpu.memory_space<vmem>>, %arg7: memref<16x64xbf16, #tpu.memory_space<vmem>>, %arg8: memref<1x16x128xf32, #tpu.memory_space<vmem>>) attributes {dimension_semantics = [#tpu.dimension_semantics<parallel>], iteration_bounds = array<i64: 4>, scalar_prefetch = 0 : i64, scratch_operands = 0 : i64, tpu.core_type = #tpu.core_type<tc>, window_params = [{transform_indices = @transform_0, window_bounds = array<i64: 1, 4, 128>}, {pipeline_mode = #tpu.pipeline_mode<synchronous>, transform_indices = @transform_1, window_bounds = array<i64: 32, 16>}, {pipeline_mode = #tpu.pipeline_mode<synchronous>, transform_indices = @transform_2, window_bounds = array<i64: 16, 64>}, {pipeline_mode = #tpu.pipeline_mode<synchronous>, transform_indices = @transform_3, window_bounds = array<i64: 16, 64>}, {pipeline_mode = #tpu.pipeline_mode<synchronous>, transform_indices = @transform_4, window_bounds = array<i64: 16, 64>}, {pipeline_mode = #tpu.pipeline_mode<synchronous>, transform_indices = @transform_5, window_bounds = array<i64: 16, 64>}, {pipeline_mode = #tpu.pipeline_mode<synchronous>, transform_indices = @transform_6, window_bounds = array<i64: 16, 64>}, {transform_indices = @transform_7, window_bounds = array<i64: 1, 16, 128>}]} {
    %0 = tpu.iota {dimensions = array<i32: 1>} : vector<1x128xi32>
    %c0 = arith.constant 0 : index
    %c0_0 = arith.constant 0 : index
    %c0_1 = arith.constant 0 : index
    %1 = vector.load %arg1[%c0, %c0_0, %c0_1] : memref<1x4x128xf32, #tpu.memory_space<vmem>>, vector<1x4x128xf32>
    %2 = vector.shape_cast %1 : vector<1x4x128xf32> to vector<4x128xf32>
    %c1_i32 = arith.constant 1 : i32
    %3 = vector.broadcast %c1_i32 : i32 to vector<1x128xi32>
    %4 = arith.cmpi sge, %0, %3 : vector<1x128xi32>
    %c129_i32 = arith.constant 129 : i32
    %5 = vector.broadcast %c129_i32 : i32 to vector<1x128xi32>
    %6 = arith.cmpi slt, %0, %5 : vector<1x128xi32>
    %7 = arith.andi %4, %6 : vector<1x128xi1>
    %c-1_i32 = arith.constant -1 : i32
    %8 = vector.broadcast %c-1_i32 : i32 to vector<1x128xi32>
    %9 = arith.cmpi sge, %0, %8 : vector<1x128xi32>
    %c127_i32 = arith.constant 127 : i32
    %10 = vector.broadcast %c127_i32 : i32 to vector<1x128xi32>
    %11 = arith.cmpi slt, %0, %10 : vector<1x128xi32>
    %12 = arith.andi %9, %11 : vector<1x128xi1>
    %c1_i32_2 = arith.constant 1 : i32
    %13 = tpu.dynamic_rotate %2 by %c1_i32_2 dim 1 : vector<4x128xf32>, i32 -> vector<4x128xf32>
    %cst = arith.constant 0.000000e+00 : f32
    %14 = vector.shape_cast %7 : vector<1x128xi1> to vector<1x128xi1>
    %15 = vector.broadcast %14 : vector<1x128xi1> to vector<4x128xi1>
    %16 = vector.broadcast %cst : f32 to vector<4x128xf32>
    %17 = arith.select %15, %13, %16 : vector<4x128xi1>, vector<4x128xf32>
    %c127_i32_3 = arith.constant 127 : i32
    %18 = tpu.dynamic_rotate %2 by %c127_i32_3 dim 1 : vector<4x128xf32>, i32 -> vector<4x128xf32>
    %cst_4 = arith.constant 0.000000e+00 : f32
    %19 = vector.shape_cast %12 : vector<1x128xi1> to vector<1x128xi1>
    %20 = vector.broadcast %19 : vector<1x128xi1> to vector<4x128xi1>
    %21 = vector.broadcast %cst_4 : f32 to vector<4x128xf32>
    %22 = arith.select %20, %18, %21 : vector<4x128xi1>, vector<4x128xf32>
    %23 = tpu.iota {dimensions = array<i32: 0>} : vector<4x128xi32>
    %c0_i32 = arith.constant 0 : i32
    %24 = vector.broadcast %c0_i32 : i32 to vector<4x128xi32>
    %25 = arith.cmpi eq, %23, %24 : vector<4x128xi32>
    %26 = arith.extui %25 : vector<4x128xi1> to vector<4x128xi32>
    %27 = arith.sitofp %26 : vector<4x128xi32> to vector<4x128xf32>
    %28 = tpu.concatenate %17, %2, %22, %27 in 0 : vector<4x128xf32>, vector<4x128xf32>, vector<4x128xf32>, vector<4x128xf32> -> vector<16x128xf32>
    %29 = arith.truncf %28 : vector<16x128xf32> to vector<16x128xbf16>
    %c0_5 = arith.constant 0 : index
    %c0_6 = arith.constant 0 : index
    %30 = vector.load %arg2[%c0_5, %c0_6] : memref<32x16xbf16, #tpu.memory_space<vmem>>, vector<32x16xbf16>
    %cst_7 = arith.constant dense<0.000000e+00> : vector<32x128xf32>
    %31 = tpu.matmul %30, %29, %cst_7 {dimension_numbers = #tpu.dot_dimension_numbers<[1], [0], [0], [1], [0, 0, 1, 1], [], []>} : vector<32x16xbf16>, vector<16x128xbf16>, vector<32x128xf32> -> vector<32x128xf32>
    %32 = vector.extract_strided_slice %31 {offsets = [0, 0], sizes = [16, 128], strides = [1, 1]} : vector<32x128xf32> to vector<16x128xf32>
    %cst_8 = arith.constant 0.00999999977 : f32
    %33 = vector.broadcast %cst_8 : f32 to vector<16x128xf32>
    %34 = arith.mulf %33, %32 : vector<16x128xf32>
    %35 = arith.maximumf %32, %34 : vector<16x128xf32>
    %36 = vector.extract_strided_slice %31 {offsets = [16, 0], sizes = [16, 128], strides = [1, 1]} : vector<32x128xf32> to vector<16x128xf32>
    %c1_i32_9 = arith.constant 1 : i32
    %37 = tpu.dynamic_rotate %35 by %c1_i32_9 dim 1 : vector<16x128xf32>, i32 -> vector<16x128xf32>
    %cst_10 = arith.constant 0.000000e+00 : f32
    %38 = vector.shape_cast %7 : vector<1x128xi1> to vector<1x128xi1>
    %39 = vector.broadcast %38 : vector<1x128xi1> to vector<16x128xi1>
    %40 = vector.broadcast %cst_10 : f32 to vector<16x128xf32>
    %41 = arith.select %39, %37, %40 : vector<16x128xi1>, vector<16x128xf32>
    %c127_i32_11 = arith.constant 127 : i32
    %42 = tpu.dynamic_rotate %35 by %c127_i32_11 dim 1 : vector<16x128xf32>, i32 -> vector<16x128xf32>
    %cst_12 = arith.constant 0.000000e+00 : f32
    %43 = vector.shape_cast %12 : vector<1x128xi1> to vector<1x128xi1>
    %44 = vector.broadcast %43 : vector<1x128xi1> to vector<16x128xi1>
    %45 = vector.broadcast %cst_12 : f32 to vector<16x128xf32>
    %46 = arith.select %44, %42, %45 : vector<16x128xi1>, vector<16x128xf32>
    %47 = tpu.iota {dimensions = array<i32: 0>} : vector<16x128xi32>
    %c0_i32_13 = arith.constant 0 : i32
    %48 = vector.broadcast %c0_i32_13 : i32 to vector<16x128xi32>
    %49 = arith.cmpi eq, %47, %48 : vector<16x128xi32>
    %50 = arith.extui %49 : vector<16x128xi1> to vector<16x128xi32>
    %51 = arith.sitofp %50 : vector<16x128xi32> to vector<16x128xf32>
    %52 = tpu.concatenate %41, %35, %46, %51 in 0 : vector<16x128xf32>, vector<16x128xf32>, vector<16x128xf32>, vector<16x128xf32> -> vector<64x128xf32>
    %53 = arith.truncf %52 : vector<64x128xf32> to vector<64x128xbf16>
    %c0_14 = arith.constant 0 : index
    %c0_15 = arith.constant 0 : index
    %54 = vector.load %arg3[%c0_14, %c0_15] : memref<16x64xbf16, #tpu.memory_space<vmem>>, vector<16x64xbf16>
    %cst_16 = arith.constant dense<0.000000e+00> : vector<16x128xf32>
    %55 = tpu.matmul %54, %53, %cst_16 {dimension_numbers = #tpu.dot_dimension_numbers<[1], [0], [0], [1], [0, 0, 1, 1], [], []>} : vector<16x64xbf16>, vector<64x128xbf16>, vector<16x128xf32> -> vector<16x128xf32>
    %cst_17 = arith.constant 0.00999999977 : f32
    %56 = vector.broadcast %cst_17 : f32 to vector<16x128xf32>
    %57 = arith.mulf %56, %55 : vector<16x128xf32>
    %58 = arith.maximumf %55, %57 : vector<16x128xf32>
    %59 = arith.addf %58, %36 : vector<16x128xf32>
    %cst_18 = arith.constant 0.00999999977 : f32
    %60 = vector.broadcast %cst_18 : f32 to vector<16x128xf32>
    %61 = arith.mulf %60, %59 : vector<16x128xf32>
    %62 = arith.maximumf %59, %61 : vector<16x128xf32>
    %c2_i32 = arith.constant 2 : i32
    %63 = vector.broadcast %c2_i32 : i32 to vector<1x128xi32>
    %64 = arith.cmpi sge, %0, %63 : vector<1x128xi32>
    %c130_i32 = arith.constant 130 : i32
    %65 = vector.broadcast %c130_i32 : i32 to vector<1x128xi32>
    %66 = arith.cmpi slt, %0, %65 : vector<1x128xi32>
    %67 = arith.andi %64, %66 : vector<1x128xi1>
    %c-2_i32 = arith.constant -2 : i32
    %68 = vector.broadcast %c-2_i32 : i32 to vector<1x128xi32>
    %69 = arith.cmpi sge, %0, %68 : vector<1x128xi32>
    %c126_i32 = arith.constant 126 : i32
    %70 = vector.broadcast %c126_i32 : i32 to vector<1x128xi32>
    %71 = arith.cmpi slt, %0, %70 : vector<1x128xi32>
    %72 = arith.andi %69, %71 : vector<1x128xi1>
    %c2_i32_19 = arith.constant 2 : i32
    %73 = tpu.dynamic_rotate %62 by %c2_i32_19 dim 1 : vector<16x128xf32>, i32 -> vector<16x128xf32>
    %cst_20 = arith.constant 0.000000e+00 : f32
    %74 = vector.shape_cast %67 : vector<1x128xi1> to vector<1x128xi1>
    %75 = vector.broadcast %74 : vector<1x128xi1> to vector<16x128xi1>
    %76 = vector.broadcast %cst_20 : f32 to vector<16x128xf32>
    %77 = arith.select %75, %73, %76 : vector<16x128xi1>, vector<16x128xf32>
    %c126_i32_21 = arith.constant 126 : i32
    %78 = tpu.dynamic_rotate %62 by %c126_i32_21 dim 1 : vector<16x128xf32>, i32 -> vector<16x128xf32>
    %cst_22 = arith.constant 0.000000e+00 : f32
    %79 = vector.shape_cast %72 : vector<1x128xi1> to vector<1x128xi1>
    %80 = vector.broadcast %79 : vector<1x128xi1> to vector<16x128xi1>
    %81 = vector.broadcast %cst_22 : f32 to vector<16x128xf32>
    %82 = arith.select %80, %78, %81 : vector<16x128xi1>, vector<16x128xf32>
    %83 = tpu.iota {dimensions = array<i32: 0>} : vector<16x128xi32>
    %c0_i32_23 = arith.constant 0 : i32
    %84 = vector.broadcast %c0_i32_23 : i32 to vector<16x128xi32>
    %85 = arith.cmpi eq, %83, %84 : vector<16x128xi32>
    %86 = arith.extui %85 : vector<16x128xi1> to vector<16x128xi32>
    %87 = arith.sitofp %86 : vector<16x128xi32> to vector<16x128xf32>
    %88 = tpu.concatenate %77, %62, %82, %87 in 0 : vector<16x128xf32>, vector<16x128xf32>, vector<16x128xf32>, vector<16x128xf32> -> vector<64x128xf32>
    %89 = arith.truncf %88 : vector<64x128xf32> to vector<64x128xbf16>
    %c0_24 = arith.constant 0 : index
    %c0_25 = arith.constant 0 : index
    %90 = vector.load %arg4[%c0_24, %c0_25] : memref<16x64xbf16, #tpu.memory_space<vmem>>, vector<16x64xbf16>
    %cst_26 = arith.constant dense<0.000000e+00> : vector<16x128xf32>
    %91 = tpu.matmul %90, %89, %cst_26 {dimension_numbers = #tpu.dot_dimension_numbers<[1], [0], [0], [1], [0, 0, 1, 1], [], []>} : vector<16x64xbf16>, vector<64x128xbf16>, vector<16x128xf32> -> vector<16x128xf32>
    %cst_27 = arith.constant 0.00999999977 : f32
    %92 = vector.broadcast %cst_27 : f32 to vector<16x128xf32>
    %93 = arith.mulf %92, %91 : vector<16x128xf32>
    %94 = arith.maximumf %91, %93 : vector<16x128xf32>
    %c2_i32_28 = arith.constant 2 : i32
    %95 = tpu.dynamic_rotate %94 by %c2_i32_28 dim 1 : vector<16x128xf32>, i32 -> vector<16x128xf32>
    %cst_29 = arith.constant 0.000000e+00 : f32
    %96 = vector.shape_cast %67 : vector<1x128xi1> to vector<1x128xi1>
    %97 = vector.broadcast %96 : vector<1x128xi1> to vector<16x128xi1>
    %98 = vector.broadcast %cst_29 : f32 to vector<16x128xf32>
    %99 = arith.select %97, %95, %98 : vector<16x128xi1>, vector<16x128xf32>
    %c126_i32_30 = arith.constant 126 : i32
    %100 = tpu.dynamic_rotate %94 by %c126_i32_30 dim 1 : vector<16x128xf32>, i32 -> vector<16x128xf32>
    %cst_31 = arith.constant 0.000000e+00 : f32
    %101 = vector.shape_cast %72 : vector<1x128xi1> to vector<1x128xi1>
    %102 = vector.broadcast %101 : vector<1x128xi1> to vector<16x128xi1>
    %103 = vector.broadcast %cst_31 : f32 to vector<16x128xf32>
    %104 = arith.select %102, %100, %103 : vector<16x128xi1>, vector<16x128xf32>
    %105 = tpu.iota {dimensions = array<i32: 0>} : vector<16x128xi32>
    %c0_i32_32 = arith.constant 0 : i32
    %106 = vector.broadcast %c0_i32_32 : i32 to vector<16x128xi32>
    %107 = arith.cmpi eq, %105, %106 : vector<16x128xi32>
    %108 = arith.extui %107 : vector<16x128xi1> to vector<16x128xi32>
    %109 = arith.sitofp %108 : vector<16x128xi32> to vector<16x128xf32>
    %110 = tpu.concatenate %99, %94, %104, %109 in 0 : vector<16x128xf32>, vector<16x128xf32>, vector<16x128xf32>, vector<16x128xf32> -> vector<64x128xf32>
    %111 = arith.truncf %110 : vector<64x128xf32> to vector<64x128xbf16>
    %c0_33 = arith.constant 0 : index
    %c0_34 = arith.constant 0 : index
    %112 = vector.load %arg5[%c0_33, %c0_34] : memref<16x64xbf16, #tpu.memory_space<vmem>>, vector<16x64xbf16>
    %cst_35 = arith.constant dense<0.000000e+00> : vector<16x128xf32>
    %113 = tpu.matmul %112, %111, %cst_35 {dimension_numbers = #tpu.dot_dimension_numbers<[1], [0], [0], [1], [0, 0, 1, 1], [], []>} : vector<16x64xbf16>, vector<64x128xbf16>, vector<16x128xf32> -> vector<16x128xf32>
    %cst_36 = arith.constant 0.00999999977 : f32
    %114 = vector.broadcast %cst_36 : f32 to vector<16x128xf32>
    %115 = arith.mulf %114, %113 : vector<16x128xf32>
    %116 = arith.maximumf %113, %115 : vector<16x128xf32>
    %117 = arith.addf %116, %62 : vector<16x128xf32>
    %cst_37 = arith.constant 0.00999999977 : f32
    %118 = vector.broadcast %cst_37 : f32 to vector<16x128xf32>
    %119 = arith.mulf %118, %117 : vector<16x128xf32>
    %120 = arith.maximumf %117, %119 : vector<16x128xf32>
    %c4_i32 = arith.constant 4 : i32
    %121 = vector.broadcast %c4_i32 : i32 to vector<1x128xi32>
    %122 = arith.cmpi sge, %0, %121 : vector<1x128xi32>
    %c132_i32 = arith.constant 132 : i32
    %123 = vector.broadcast %c132_i32 : i32 to vector<1x128xi32>
    %124 = arith.cmpi slt, %0, %123 : vector<1x128xi32>
    %125 = arith.andi %122, %124 : vector<1x128xi1>
    %c-4_i32 = arith.constant -4 : i32
    %126 = vector.broadcast %c-4_i32 : i32 to vector<1x128xi32>
    %127 = arith.cmpi sge, %0, %126 : vector<1x128xi32>
    %c124_i32 = arith.constant 124 : i32
    %128 = vector.broadcast %c124_i32 : i32 to vector<1x128xi32>
    %129 = arith.cmpi slt, %0, %128 : vector<1x128xi32>
    %130 = arith.andi %127, %129 : vector<1x128xi1>
    %c4_i32_38 = arith.constant 4 : i32
    %131 = tpu.dynamic_rotate %120 by %c4_i32_38 dim 1 : vector<16x128xf32>, i32 -> vector<16x128xf32>
    %cst_39 = arith.constant 0.000000e+00 : f32
    %132 = vector.shape_cast %125 : vector<1x128xi1> to vector<1x128xi1>
    %133 = vector.broadcast %132 : vector<1x128xi1> to vector<16x128xi1>
    %134 = vector.broadcast %cst_39 : f32 to vector<16x128xf32>
    %135 = arith.select %133, %131, %134 : vector<16x128xi1>, vector<16x128xf32>
    %c124_i32_40 = arith.constant 124 : i32
    %136 = tpu.dynamic_rotate %120 by %c124_i32_40 dim 1 : vector<16x128xf32>, i32 -> vector<16x128xf32>
    %cst_41 = arith.constant 0.000000e+00 : f32
    %137 = vector.shape_cast %130 : vector<1x128xi1> to vector<1x128xi1>
    %138 = vector.broadcast %137 : vector<1x128xi1> to vector<16x128xi1>
    %139 = vector.broadcast %cst_41 : f32 to vector<16x128xf32>
    %140 = arith.select %138, %136, %139 : vector<16x128xi1>, vector<16x128xf32>
    %141 = tpu.iota {dimensions = array<i32: 0>} : vector<16x128xi32>
    %c0_i32_42 = arith.constant 0 : i32
    %142 = vector.broadcast %c0_i32_42 : i32 to vector<16x128xi32>
    %143 = arith.cmpi eq, %141, %142 : vector<16x128xi32>
    %144 = arith.extui %143 : vector<16x128xi1> to vector<16x128xi32>
    %145 = arith.sitofp %144 : vector<16x128xi32> to vector<16x128xf32>
    %146 = tpu.concatenate %135, %120, %140, %145 in 0 : vector<16x128xf32>, vector<16x128xf32>, vector<16x128xf32>, vector<16x128xf32> -> vector<64x128xf32>
    %147 = arith.truncf %146 : vector<64x128xf32> to vector<64x128xbf16>
    %c0_43 = arith.constant 0 : index
    %c0_44 = arith.constant 0 : index
    %148 = vector.load %arg6[%c0_43, %c0_44] : memref<16x64xbf16, #tpu.memory_space<vmem>>, vector<16x64xbf16>
    %cst_45 = arith.constant dense<0.000000e+00> : vector<16x128xf32>
    %149 = tpu.matmul %148, %147, %cst_45 {dimension_numbers = #tpu.dot_dimension_numbers<[1], [0], [0], [1], [0, 0, 1, 1], [], []>} : vector<16x64xbf16>, vector<64x128xbf16>, vector<16x128xf32> -> vector<16x128xf32>
    %cst_46 = arith.constant 0.00999999977 : f32
    %150 = vector.broadcast %cst_46 : f32 to vector<16x128xf32>
    %151 = arith.mulf %150, %149 : vector<16x128xf32>
    %152 = arith.maximumf %149, %151 : vector<16x128xf32>
    %c4_i32_47 = arith.constant 4 : i32
    %153 = tpu.dynamic_rotate %152 by %c4_i32_47 dim 1 : vector<16x128xf32>, i32 -> vector<16x128xf32>
    %cst_48 = arith.constant 0.000000e+00 : f32
    %154 = vector.shape_cast %125 : vector<1x128xi1> to vector<1x128xi1>
    %155 = vector.broadcast %154 : vector<1x128xi1> to vector<16x128xi1>
    %156 = vector.broadcast %cst_48 : f32 to vector<16x128xf32>
    %157 = arith.select %155, %153, %156 : vector<16x128xi1>, vector<16x128xf32>
    %c124_i32_49 = arith.constant 124 : i32
    %158 = tpu.dynamic_rotate %152 by %c124_i32_49 dim 1 : vector<16x128xf32>, i32 -> vector<16x128xf32>
    %cst_50 = arith.constant 0.000000e+00 : f32
    %159 = vector.shape_cast %130 : vector<1x128xi1> to vector<1x128xi1>
    %160 = vector.broadcast %159 : vector<1x128xi1> to vector<16x128xi1>
    %161 = vector.broadcast %cst_50 : f32 to vector<16x128xf32>
    %162 = arith.select %160, %158, %161 : vector<16x128xi1>, vector<16x128xf32>
    %163 = tpu.iota {dimensions = array<i32: 0>} : vector<16x128xi32>
    %c0_i32_51 = arith.constant 0 : i32
    %164 = vector.broadcast %c0_i32_51 : i32 to vector<16x128xi32>
    %165 = arith.cmpi eq, %163, %164 : vector<16x128xi32>
    %166 = arith.extui %165 : vector<16x128xi1> to vector<16x128xi32>
    %167 = arith.sitofp %166 : vector<16x128xi32> to vector<16x128xf32>
    %168 = tpu.concatenate %157, %152, %162, %167 in 0 : vector<16x128xf32>, vector<16x128xf32>, vector<16x128xf32>, vector<16x128xf32> -> vector<64x128xf32>
    %169 = arith.truncf %168 : vector<64x128xf32> to vector<64x128xbf16>
    %c0_52 = arith.constant 0 : index
    %c0_53 = arith.constant 0 : index
    %170 = vector.load %arg7[%c0_52, %c0_53] : memref<16x64xbf16, #tpu.memory_space<vmem>>, vector<16x64xbf16>
    %cst_54 = arith.constant dense<0.000000e+00> : vector<16x128xf32>
    %171 = tpu.matmul %170, %169, %cst_54 {dimension_numbers = #tpu.dot_dimension_numbers<[1], [0], [0], [1], [0, 0, 1, 1], [], []>} : vector<16x64xbf16>, vector<64x128xbf16>, vector<16x128xf32> -> vector<16x128xf32>
    %cst_55 = arith.constant 0.00999999977 : f32
    %172 = vector.broadcast %cst_55 : f32 to vector<16x128xf32>
    %173 = arith.mulf %172, %171 : vector<16x128xf32>
    %174 = arith.maximumf %171, %173 : vector<16x128xf32>
    %175 = arith.addf %174, %120 : vector<16x128xf32>
    %cst_56 = arith.constant 0.00999999977 : f32
    %176 = vector.broadcast %cst_56 : f32 to vector<16x128xf32>
    %177 = arith.mulf %176, %175 : vector<16x128xf32>
    %178 = arith.maximumf %175, %177 : vector<16x128xf32>
    %c0_57 = arith.constant 0 : index
    %c0_58 = arith.constant 0 : index
    %c0_59 = arith.constant 0 : index
    %179 = vector.load %arg8[%c0_57, %c0_58, %c0_59] : memref<1x16x128xf32, #tpu.memory_space<vmem>>, vector<1x16x128xf32>
    %180 = vector.shape_cast %179 : vector<1x16x128xf32> to vector<16x128xf32>
    %181 = vector.shape_cast %178 : vector<16x128xf32> to vector<1x16x128xf32>
    tpu.vector_store %arg8[%c0_57, %c0_58, %c0_59], %181 {strides = array<i32>} : memref<1x16x128xf32, #tpu.memory_space<vmem>>, vector<1x16x128xf32>,
    return
  }
  func.func @transform_0(%arg0: i32) -> (i32, i32, i32) {
    %c0_i32 = arith.constant 0 : i32
    %c0_i32_0 = arith.constant 0 : i32
    %c0_i32_1 = arith.constant 0 : i32
    return %arg0, %c0_i32, %c0_i32_0 : i32, i32, i32
  }
  func.func @transform_1(%arg0: i32) -> (i32, i32) {
    %c0_i32 = arith.constant 0 : i32
    %c0_i32_0 = arith.constant 0 : i32
    %c0_i32_1 = arith.constant 0 : i32
    return %c0_i32, %c0_i32_0 : i32, i32
  }
  func.func @transform_2(%arg0: i32) -> (i32, i32) {
    %c0_i32 = arith.constant 0 : i32
    %c0_i32_0 = arith.constant 0 : i32
    %c0_i32_1 = arith.constant 0 : i32
    return %c0_i32, %c0_i32_0 : i32, i32
  }
  func.func @transform_3(%arg0: i32) -> (i32, i32) {
    %c0_i32 = arith.constant 0 : i32
    %c0_i32_0 = arith.constant 0 : i32
    %c0_i32_1 = arith.constant 0 : i32
    return %c0_i32, %c0_i32_0 : i32, i32
  }
  func.func @transform_4(%arg0: i32) -> (i32, i32) {
    %c0_i32 = arith.constant 0 : i32
    %c0_i32_0 = arith.constant 0 : i32
    %c0_i32_1 = arith.constant 0 : i32
    return %c0_i32, %c0_i32_0 : i32, i32
  }
  func.func @transform_5(%arg0: i32) -> (i32, i32) {
    %c0_i32 = arith.constant 0 : i32
    %c0_i32_0 = arith.constant 0 : i32
    %c0_i32_1 = arith.constant 0 : i32
    return %c0_i32, %c0_i32_0 : i32, i32
  }
  func.func @transform_6(%arg0: i32) -> (i32, i32) {
    %c0_i32 = arith.constant 0 : i32
    %c0_i32_0 = arith.constant 0 : i32
    %c0_i32_1 = arith.constant 0 : i32
    return %c0_i32, %c0_i32_0 : i32, i32
  }
  func.func @transform_7(%arg0: i32) -> (i32, i32, i32) {
    %c0_i32 = arith.constant 0 : i32
    %c0_i32_0 = arith.constant 0 : i32
    %c0_i32_1 = arith.constant 0 : i32
    return %arg0, %c0_i32, %c0_i32_0 : i32, i32, i32
  }
}

</mosaic_0001>

<bundles_post_ra>
// kernel: fwd.1
= control target key start
LH: loop header
LB: loop body
LE: loop exit
PB: predicated region body
PF: predicated region fallthrough
CT: control target
= control target key end

     0   :  { %12 = vsyncpa [#allocation3], 0  ;;  %s1623_s0 = inlined_call_operand.vmem [shape: f32[4,4,128], index: 0, kind: input, shape index: {}]   ;;  %s1624_s1 = inlined_call_operand.vmem [shape: bf16[32,16], index: 1, kind: input, shape index: {}]   ;;  %s1625_s2 = inlined_call_operand.vmem [shape: bf16[16,64], index: 2, kind: input, shape index: {}]   ;;  %s1626_s3 = inlined_call_operand.vmem [shape: bf16[16,64], index: 3, kind: input, shape index: {}]   ;;  %s1627_s4 = inlined_call_operand.vmem [shape: bf16[16,64], index: 4, kind: input, shape index: {}]   ;;  %s1628_s5 = inlined_call_operand.hbm [shape: bf16[16,64], index: 5, kind: input, shape index: {}]   ;;  %s1629_s6 = inlined_call_operand.vmem [shape: bf16[16,64], index: 6, kind: input, shape index: {}]   ;;  %s1630_s7 = inlined_call_operand.hbm [shape: f32[4,16,128], index: 7, kind: output, shape index: {}]  }
   0x1   :  { %13 = vsyncpa [#allocation4], 0 }
   0x2   :  { %15 = vsyncpa [#allocation4 + $0x1], 0  ;;  %s1323_s24 = smov 0   ;;  %s1325_s25 = smov 0  }
   0x3   :  { %s1327_s26 = smov 0   ;;  %s1329_s27 = smov 0  }
   0x4 LB: > { %s1344_s28 = sadd.s32 4294967295, %s1265_s27   ;;  %s882_s29 = sadd.s32 4294967294, %s1265_s27   ;;  %s1265_s27 = sphi %s1329_s27, %s1656_s27   ;;  %s1261_s26 = sphi %s1327_s26, %s1655_s26   ;;  %s1257_s25 = sphi %s1325_s25, %s1654_s25   ;;  %s1253_s24 = sphi %s1323_s24, %s1653_s24  }
   0x5   : > { %s1348_s30 = sadd.s32 1, %s1265_s27   ;;  %s180_s8 = sadd.s32 1, %s1261_s26 }
   0x6   : > { %s177_s9 = ssub.s32 %s1265_s27, %s1348_s30  ;;  %p190_p0 = scmp.ne.s32.totalorder %s1261_s26, %s1257_s25 }
   0x7   : > { %p178_p1 = scmp.eq.s32.totalorder %s177_s9, 0  ;;  %p191_p2 = scmp.eq.s32.totalorder %s1344_s28, 3 }
   0x8   : > { %p196_p3 = scmp.ne.s32.totalorder %s1257_s25, %s1253_s24  ;;  %p197_p4 = scmp.eq.s32.totalorder %s882_s29, 3 }
   0x9   : > { %s1359_s10 = scalar_select %p178_p1, %s1261_s26, %s180_s8  }
   0xa   : > { %p1361_p5 = por %p191_p2, %p190_p0  ;;  %p1365_p6 = por %p197_p4, %p196_p3 }
   0xb   : > { %p883_p7 = scmp.ge.s32.totalorder %s1265_s27, 1  ;;  %p204_p8 = scmp.lt.s32.totalorder %s1265_s27, 5 }
   0xc   : > { %s1634_s11 = scalar_select %p1361_p5, 1, 0 }
   0xd   : > { %s1635_s12 = scalar_select %p1365_p6, 1, 0 }
   0xe   : > { %p1631_p9 = scmp.eq.s32.totalorder %s1344_s28, 0  ;;  %p1372_p10 = pnand %p883_p7, %p204_p8 }
   0xf   : > { %s1267_s14 = smov [#allocation2]   ;;  %s1171_s19 = scalar_lea.hbm %s1628_s5, 128 }
  0x10   : > { %s1636_s13 = scalar_select %p1372_p10, 1, 0 }
  0x11   : > { %s228_s15 = sshll.u32 %s1267_s14, 4  ;;  %p1056_p11 = pneg %p1372_p10  ;;  %s229_s15 = int_to_ptr.vmem [resolvable:$true] %s228_s15 }
  0x12   : > { %p1172_p13 = scmp.ne.s32.totalorder %s1628_s5, %s1171_s19  ;;  %p1178_p3 = scmp.lt.u32.totalorder %s1171_s19, %s1628_s5 }
  0x13   : > { %p1380_p12 = pnand %p1631_p9, %p1056_p11 }
  0x15   : > { %p1173_p0 = pneg %p1380_p12 }
  0x17   : > { %p1174_p1 = pnand %p1173_p0, %p1172_p13 }
  0x19   : > { %p1175_p2 = pneg %p1174_p1 }
  0x1b   : > { %p1180_p4 = pnand %p1178_p3, %p1175_p2 }
  0x1d   : > { %1183 = shalt.err (!%p1180_p4)
}
  0x1e   : > { %s1184_s29 = scalar_lea.vmem %s229_s15, 128  ;;  %p1192_p9 = scmp.lt.s32.totalorder %s229_s15, %s229_s15 }
  0x1f   : > { %p1185_p7 = scmp.ne.s32.totalorder %s229_s15, %s1184_s29  ;;  %p1193_p6 = scmp.lt.s32.totalorder %s1184_s29, %s1184_s29 }
  0x21   : > { %p1187_p8 = pnand %p1185_p7, %p1173_p0  ;;  %p1194_p5 = por %p1193_p6, %p1192_p9 }
  0x23   : > { %p1188_p11 = pneg %p1187_p8 }
  0x25   : > { %p1195_p10 = pnand %p1194_p5, %p1188_p11 }
  0x27   : > { %1198 = shalt.err (!%p1195_p10)
}
  0x28   : > { %s1268_s8 = smov 64   ;;  %s1269_s9 = smov 4  }
  0x29   : > { %1059 = dma.hbm_to_vmem [thread:$0]  (!%p1380_p12), %s1628_s5, 128, %s229_s15, [#allocation3], %s1268_s8, %s1268_s8, %s1269_s9  }
  0x2a   : > { %p1638_p13 = scmp.ne.s32.totalorder %s1636_s13, 0 }
  0x2b   : > { %p1639_p1 = scmp.eq.s32.totalorder (!%p1638_p13), %s1344_s28, 0 }
  0x2c   : > { %254 = sbr.rel (%p1638_p13) target bundleno = 2208 (0x8a0), region = 48 }
  0x33   : > { %1244 = dma.done.wait (%p1639_p1), [#allocation3], 128   ;;  %p1640_p0 = pmov %p1639_p1 }
  0x34   : > { %p285_p5 = scmp.lt.s32.totalorder %s1344_s28, 3  ;;  %v1270_v0 = vmov 0.0   ;;  %vm338_vm0 = vcmask 130048   ;;  %s1271_s13 = smov 1   ;;  %v1164_v2 = vld [vmem:[%s1624_s1] sm:$0xff]   ;;  %v290_v3 = vlaneseq  ;;  %vm320_vm4 = vcmask 1043456  }
  0x35   : > { %1246 = vsyncadd (%p1640_p0), [#allocation3], 4294967168  ;;  %990 = vmatprep.subr.bf16.mxu1 %v1270_v0  ;;  %986 = vmatprep.mubr.msk.bf16.mxu0 %vm338_vm0, %v1164_v2  ;;  %s1272_s23 = smov 127   ;;  %v1165_v16 = vld [vmem:[%s1624_s1 + $0x8] sm:$0xff]   ;;  %vm1273_vm5 = vmmov 0   ;;  %v1274_v35 = vmov 1.0  }
  0x36   : > { %s286_s16 = scalar_select %p285_p5, %s1344_s28, 3  ;;  %v310_v4 = vshrl.u32 %v290_v3, 7  ;;  %v1418_v5 = vand.u32 127, %v290_v3  ;;  %998 = vmatprep.mubr.msk.bf16.mxu1 %vm1273_vm5, %v1270_v0  ;;  %v1448_v36 = vpack.c.bf16 %v1270_v0, %v1274_v35  ;;  %vm1275_vm8 = vmmov 1   ;;  %v1166_v38 = vld [vmem:[%s1625_s2] sm:$0xff]  }
  0x37   : > { %vm425_vm10 = vcmask 523264   ;;  %s1276_s17 = smov 126   ;;  %v1167_v2 = vld [vmem:[%s1626_s3] sm:$0xff]   ;;  %s1279_s21 = smov 4  }
  0x38   : > { %s889_s18 = sshll.u32 %s286_s16, 2  ;;  %vm311_vm1 = vcmp.eq.s32.totalorder %v310_v4, 0  ;;  %vm293_vm2 = vcmp.ge.s32.totalorder %v1418_v5, 1  ;;  %vm297_vm3 = vcmp.lt.s32.totalorder %v1418_v5, 127  ;;  %s1277_s16 = smov 2   ;;  %vm480_vm11 = vcmp.ge.s32.totalorder %v1418_v5, 2 }
  0x39   : > { %s288_s15 = scalar_lea.vmem %s1623_s0, %s889_s18  ;;  %v890_v6 = vsel %vm311_vm1, 1.0, %v1270_v0  ;;  %vm896_vm6 = vmpackc.low %vm293_vm2, %vm293_vm2  ;;  %vm484_vm13 = vcmp.lt.s32.totalorder %v1418_v5, 126  ;;  %vm636_vm15 = vcmp.ge.s32.totalorder %v1418_v5, 4  ;;  %s282_s29 = sand.u32 1, %s1257_s25  }
  0x3a   : > { %v292_v1 = vld [vmem:[%s288_s15] sm:$0xf]  ;;  %v318_v9 = vrot.slane %v890_v6, 4  ;;  %vm899_vm7 = vmpackc.low %vm297_vm3, %vm297_vm3  ;;  %s888_s8 = sshll.u32 %s282_s29, 4  ;;  %s1582_s20 = scalar_lea.sflag [#allocation4], %s282_s29 }
  0x3b   : > { %299 = vrot.lane.b32.xlu0 %v292_v1, %s1271_s13  ;;  %v315_v8 = vrot.slane %v292_v1, 4  ;;  %vm1452_vm9 = vmpackc.low %vm1275_vm8, %vm311_vm1  ;;  %vm640_vm1 = vcmp.lt.s32.totalorder %v1418_v5, 124  ;;  %s284_s9 = scalar_lea.vmem [#allocation5], %s888_s8  ;;  %p1651_p9 = scmp.ne.s32.totalorder %s1634_s11, 0 }
  0x3c   : > { %vm1475_vm12 = vmpackc.low %vm480_vm11, %vm480_vm11  ;;  %s808_s14 = sshll.u32 %s284_s9, 4  ;;  %s1575_s14 = int_to_ptr.vmem [resolvable:$true] %s808_s14 }
  0x3d   : > { %vm1486_vm14 = vmpackc.low %vm484_vm13, %vm484_vm13  ;;  %s1199_s15 = scalar_lea.vmem %s1575_s14, 256 }
  0x3e   : > { %p1200_p6 = scmp.ne.s32.totalorder %s1575_s14, %s1199_s15 }
  0x3f   : > { %304 = vrot.lane.b32.xlu0 %v292_v1, %s1272_s23 }
  0x40   : > { %p1201_p10 = pnand %p1200_p6, %p1651_p9 }
  0x42   : > { %p1202_p12 = pneg %p1201_p10 }
  0xad   : > { %v300_v7 = vpop.permute.xlu0 %299 }
  0xae   : > { %v303_v10 = vsel %vm293_vm2, %v300_v7, 0.0  ;;  %vm1544_vm2 = vmpackc.low %vm640_vm1, %vm640_vm1 }
  0xaf   : > { %v321_v13 = vsel %vm320_vm4, %v303_v10, %v315_v8 }
  0xb1   : > { %v305_v11 = vpop.permute.xlu0 %304 }
  0xb2   : > { %v308_v12 = vsel %vm297_vm3, %v305_v11, 0.0 }
  0xb3   : > { %v322_v14 = vsel %vm320_vm4, %v308_v12, %v318_v9 }
  0xb4   : > { %v323_v15 = vpack.c.bf16 %v322_v14, %v321_v13 }
  0xb6   : > { %984 = vmatprep.subr.bf16.mxu0 %v323_v15 }
  0xb7   : > { %985 = vmatpush3.bf16.msra.mxu0 %v323_v15 }
  0xb8   : > { %1002 = vmatprep.subr.bf16.mxu0 %v1270_v0 }
  0xba   : > { %987 = vmatmul.mubr.msk.bf16.vlgmr.msra.gmra.mrb[0].mxu0 %vm338_vm0, %v1165_v16  ;;  %vm1533_vm0 = vmpackc.low %vm636_vm15, %vm636_vm15 }
  0xbb   : > { %1010 = vmatprep.mubr.msk.bf16.mxu0 %vm1273_vm5, %v1270_v0 }
 0x18d   : > { %v988_v17 = vpop.f32.mrb[0].mxu0 }
 0x18e   : > { %v379_v18 = vpop.f32.mrb[1].mxu0 }
 0x18f   : > { %v394_v19 = vmul.f32 0.01, %v379_v18  ;;  %v989_v20 = vpop.f32.mrb[2].mxu0 }
 0x190   : > { %v382_v21 = vpop.f32.mrb[3].mxu0 }
 0x191   : > { %v395_v22 = vmul.f32 0.01, %v382_v21  ;;  %v396_v23 = vmax.f32 %v379_v18, %v394_v19 }
 0x193   : > { %v397_v24 = vmax.f32 %v382_v21, %v395_v22  ;;  %v1168_v22 = vld [vmem:[%s1627_s4] sm:$0xff]  }
 0x195   : > { %v1114_v25 = vpack.i.bf16 %v397_v24, %v396_v23  ;;  %v415_v26 = vpack.c.bf16 %v397_v24, %v396_v23 }
 0x197   : > { %1115 = vrot.lane.b32.xlu1 %v1114_v25, %s1271_s13  ;;  %s1278_s13 = smov 124  }
 0x19b   : > { %1120 = vrot.lane.b32.xlu1 %v1114_v25, %s1272_s23 }
 0x209   : > { %v1116_v27 = vpop.permute.xlu1 %1115 }
 0x20a   : > { %v1118_v28 = vunpack.i.h.bf16 %v1116_v27  ;;  %v1117_v29 = vunpack.i.l.bf16 %v1116_v27 }
 0x20c   : > { %v897_v30 = vpack.c.bf16 %v1118_v28, %v1117_v29 }
 0x20d   : > { %v1121_v31 = vpop.permute.xlu1 %1120 }
 0x20e   : > { %991 = vmatpush3.bf16.msk.msra.mxu1 %vm896_vm6, %v897_v30  ;;  %v1123_v32 = vunpack.i.h.bf16 %v1121_v31  ;;  %v1122_v33 = vunpack.i.l.bf16 %v1121_v31 }
 0x20f   : > { %992 = vmatprep.subr.bf16.mxu1 %v1270_v0 }
 0x210   : > { %v900_v34 = vpack.c.bf16 %v1123_v32, %v1122_v33 }
 0x212   : > { %993 = vmatpush3.bf16.msra.mxu1 %v415_v26 }
 0x213   : > { %994 = vmatprep.subr.bf16.mxu1 %v1270_v0 }
 0x216   : > { %995 = vmatpush3.bf16.msk.msra.mxu1 %vm899_vm7, %v900_v34 }
 0x217   : > { %996 = vmatprep.subr.bf16.mxu1 %v1270_v0 }
 0x21a   : > { %997 = vmatpush3.bf16.msk.msra.mxu1 %vm1452_vm9, %v1448_v36 }
 0x21b   : > { %1014 = vmatprep.subr.bf16.mxu1 %v1270_v0 }
 0x21d   : > { %999 = vmatmul.mubr.msk.bf16.vlgmr.msra.gmra.mrb[0].mxu1 %vm425_vm10, %v1166_v38 }
 0x21e   : > { %1022 = vmatprep.mubr.msk.bf16.mxu1 %vm1273_vm5, %v1270_v0 }
 0x2f0   : > { %v463_v39 = vpop.f32.mrb[0].mxu1 }
 0x2f1   : > { %v470_v40 = vmul.f32 0.01, %v463_v39  ;;  %v1000_v41 = vpop.f32.mrb[1].mxu1 }
 0x2f2   : > { %v466_v42 = vpop.f32.mrb[2].mxu1 }
 0x2f3   : > { %v472_v43 = vmax.f32 %v463_v39, %v470_v40  ;;  %v471_v44 = vmul.f32 0.01, %v466_v42  ;;  %v1001_v45 = vpop.f32.mrb[3].mxu1 }
 0x2f5   : > { %v474_v46 = vadd.f32 %v988_v17, %v472_v43  ;;  %v473_v47 = vmax.f32 %v466_v42, %v471_v44 }
 0x2f7   : > { %v476_v48 = vmul.f32 0.01, %v474_v46  ;;  %v475_v49 = vadd.f32 %v989_v20, %v473_v47 }
 0x2f9   : > { %v477_v50 = vmul.f32 0.01, %v475_v49  ;;  %v1466_v51 = vmax.f32 %v474_v46, %v476_v48 }
 0x2fb   : > { %v1468_v52 = vmax.f32 %v475_v49, %v477_v50 }
 0x2fd   : > { %v1129_v53 = vpack.i.bf16 %v1468_v52, %v1466_v51  ;;  %v503_v62 = vpack.c.bf16 %v1468_v52, %v1466_v51 }
 0x2ff   : > { %1130 = vrot.lane.b32.xlu1 %v1129_v53, %s1276_s17  ;;  %1125 = vrot.lane.b32.xlu0 %v1129_v53, %s1277_s16 }
 0x371   : > { %v1126_v54 = vpop.permute.xlu0 %1125  ;;  %v1131_v59 = vpop.permute.xlu1 %1130 }
 0x372   : > { %v1128_v55 = vunpack.i.h.bf16 %v1126_v54  ;;  %v1127_v56 = vunpack.i.l.bf16 %v1126_v54  ;;  %v1133_v60 = vunpack.i.h.bf16 %v1131_v59  ;;  %v1132_v61 = vunpack.i.l.bf16 %v1131_v59 }
 0x374   : > { %v908_v58 = vpack.c.bf16 %v1128_v55, %v1127_v56  ;;  %v911_v1 = vpack.c.bf16 %v1133_v60, %v1132_v61 }
 0x376   : > { %1003 = vmatpush3.bf16.msk.msra.mxu0 %vm1475_vm12, %v908_v58 }
 0x377   : > { %1004 = vmatprep.subr.bf16.mxu0 %v1270_v0 }
 0x37a   : > { %1005 = vmatpush3.bf16.msra.mxu0 %v503_v62 }
 0x37b   : > { %1006 = vmatprep.subr.bf16.mxu0 %v1270_v0 }
 0x37e   : > { %1007 = vmatpush3.bf16.msk.msra.mxu0 %vm1486_vm14, %v911_v1 }
 0x37f   : > { %1008 = vmatprep.subr.bf16.mxu0 %v1270_v0 }
 0x382   : > { %1009 = vmatpush3.bf16.msk.msra.mxu0 %vm1452_vm9, %v1448_v36 }
 0x383   : > { %1026 = vmatprep.subr.bf16.mxu0 %v1270_v0 }
 0x385   : > { %1011 = vmatmul.mubr.msk.bf16.vlgmr.msra.gmra.mrb[4].mxu0 %vm425_vm10, %v1167_v2 }
 0x386   : > { %1034 = vmatprep.mubr.msk.bf16.mxu0 %vm1273_vm5, %v1270_v0 }
 0x458   : > { %v549_v3 = vpop.f32.mrb[4].mxu0 }
 0x459   : > { %v556_v4 = vmul.f32 0.01, %v549_v3  ;;  %v1012_v6 = vpop.f32.mrb[5].mxu0 }
 0x45a   : > { %v552_v7 = vpop.f32.mrb[6].mxu0 }
 0x45b   : > { %v557_v8 = vmul.f32 0.01, %v552_v7  ;;  %v1013_v9 = vpop.f32.mrb[7].mxu0  ;;  %v558_v10 = vmax.f32 %v549_v3, %v556_v4 }
 0x45d   : > { %v559_v11 = vmax.f32 %v552_v7, %v557_v8  ;;  %v1170_v7 = vld [vmem:[%s1629_s6] sm:$0xff]  }
 0x45f   : > { %v573_v12 = vpack.c.bf16 %v559_v11, %v558_v10  ;;  %v1139_v13 = vpack.i.bf16 %v559_v11, %v558_v10 }
 0x461   : > { %1140 = vrot.lane.b32.xlu1 %v1139_v13, %s1276_s17  ;;  %1135 = vrot.lane.b32.xlu0 %v1139_v13, %s1277_s16  ;;  %s955_s17 = sshll.u32 %s1344_s28, 8  ;;  %s1280_s28 = smov [#allocation5]  }
 0x462   : > { %s1580_s19 = scalar_lea.hbm %s1630_s7, %s955_s17 }
 0x4d3   : > { %v1136_v14 = vpop.permute.xlu0 %1135  ;;  %v1141_v18 = vpop.permute.xlu1 %1140 }
 0x4d4   : > { %v1138_v15 = vunpack.i.h.bf16 %v1136_v14  ;;  %v1137_v16 = vunpack.i.l.bf16 %v1136_v14  ;;  %v1143_v19 = vunpack.i.h.bf16 %v1141_v18  ;;  %v1142_v20 = vunpack.i.l.bf16 %v1141_v18 }
 0x4d6   : > { %v919_v17 = vpack.c.bf16 %v1138_v15, %v1137_v16  ;;  %v922_v21 = vpack.c.bf16 %v1143_v19, %v1142_v20 }
 0x4d8   : > { %1015 = vmatpush3.bf16.msk.msra.mxu1 %vm1475_vm12, %v919_v17 }
 0x4d9   : > { %1016 = vmatprep.subr.bf16.mxu1 %v1270_v0 }
 0x4dc   : > { %1017 = vmatpush3.bf16.msra.mxu1 %v573_v12 }
 0x4dd   : > { %1018 = vmatprep.subr.bf16.mxu1 %v1270_v0 }
 0x4e0   : > { %1019 = vmatpush3.bf16.msk.msra.mxu1 %vm1486_vm14, %v922_v21 }
 0x4e1   : > { %1020 = vmatprep.subr.bf16.mxu1 %v1270_v0 }
 0x4e4   : > { %1021 = vmatpush3.bf16.msk.msra.mxu1 %vm1452_vm9, %v1448_v36 }
 0x4e5   : > { %1038 = vmatprep.subr.bf16.mxu1 %v1270_v0 }
 0x4e7   : > { %1023 = vmatmul.mubr.msk.bf16.vlgmr.msra.gmra.mrb[4].mxu1 %vm425_vm10, %v1168_v22 }
 0x4e8   : > { %1046 = vmatprep.mubr.msk.bf16.mxu1 %vm1273_vm5, %v1270_v0 }
 0x5ba   : > { %v619_v23 = vpop.f32.mrb[4].mxu1 }
 0x5bb   : > { %v626_v24 = vmul.f32 0.01, %v619_v23  ;;  %v1024_v25 = vpop.f32.mrb[5].mxu1 }
 0x5bc   : > { %v622_v26 = vpop.f32.mrb[6].mxu1 }
 0x5bd   : > { %v628_v27 = vmax.f32 %v619_v23, %v626_v24  ;;  %v627_v28 = vmul.f32 0.01, %v622_v26  ;;  %v1025_v29 = vpop.f32.mrb[7].mxu1 }
 0x5bf   : > { %v630_v30 = vadd.f32 %v628_v27, %v1466_v51  ;;  %v629_v31 = vmax.f32 %v622_v26, %v627_v28  ;;  %v1169_v51 = vld [vmem:[#allocation2] sm:$0xff]  }
 0x5c1   : > { %v632_v32 = vmul.f32 0.01, %v630_v30  ;;  %v631_v33 = vadd.f32 %v629_v31, %v1468_v52 }
 0x5c3   : > { %v633_v34 = vmul.f32 0.01, %v631_v33  ;;  %v1524_v35 = vmax.f32 %v630_v30, %v632_v32 }
 0x5c5   : > { %v1526_v38 = vmax.f32 %v631_v33, %v633_v34 }
 0x5c7   : > { %v1149_v39 = vpack.i.bf16 %v1526_v38, %v1524_v35  ;;  %v659_v48 = vpack.c.bf16 %v1526_v38, %v1524_v35 }
 0x5c9   : > { %1150 = vrot.lane.b32.xlu1 %v1149_v39, %s1278_s13  ;;  %1145 = vrot.lane.b32.xlu0 %v1149_v39, %s1279_s21 }
 0x63b   : > { %v1146_v40 = vpop.permute.xlu0 %1145  ;;  %v1151_v45 = vpop.permute.xlu1 %1150 }
 0x63c   : > { %v1148_v41 = vunpack.i.h.bf16 %v1146_v40  ;;  %v1147_v42 = vunpack.i.l.bf16 %v1146_v40  ;;  %v1153_v46 = vunpack.i.h.bf16 %v1151_v45  ;;  %v1152_v47 = vunpack.i.l.bf16 %v1151_v45 }
 0x63e   : > { %v930_v44 = vpack.c.bf16 %v1148_v41, %v1147_v42  ;;  %v933_v50 = vpack.c.bf16 %v1153_v46, %v1152_v47 }
 0x640   : > { %1027 = vmatpush3.bf16.msk.msra.mxu0 %vm1533_vm0, %v930_v44 }
 0x641   : > { %1028 = vmatprep.subr.bf16.mxu0 %v1270_v0 }
 0x644   : > { %1029 = vmatpush3.bf16.msra.mxu0 %v659_v48 }
 0x645   : > { %1030 = vmatprep.subr.bf16.mxu0 %v1270_v0 }
 0x648   : > { %1031 = vmatpush3.bf16.msk.msra.mxu0 %vm1544_vm2, %v933_v50 }
 0x649   : > { %1032 = vmatprep.subr.bf16.mxu0 %v1270_v0 }
 0x64c   : > { %1033 = vmatpush3.bf16.msk.msra.mxu0 %vm1452_vm9, %v1448_v36 }
 0x64f   : > { %1035 = vmatmul.mubr.msk.bf16.vlgmr.msra.gmra.mrb[8].mxu0 %vm425_vm10, %v1169_v51 }
 0x722   : > { %v705_v5 = vpop.f32.mrb[8].mxu0 }
 0x723   : > { %v712_v52 = vmul.f32 0.01, %v705_v5  ;;  %v1036_v53 = vpop.f32.mrb[9].mxu0 }
 0x724   : > { %v708_v54 = vpop.f32.mrb[10].mxu0 }
 0x725   : > { %v713_v55 = vmul.f32 0.01, %v708_v54  ;;  %v1037_v56 = vpop.f32.mrb[11].mxu0  ;;  %v714_v57 = vmax.f32 %v705_v5, %v712_v52 }
 0x727   : > { %v715_v58 = vmax.f32 %v708_v54, %v713_v55 }
 0x729   : > { %v729_v59 = vpack.c.bf16 %v715_v58, %v714_v57  ;;  %v1159_v60 = vpack.i.bf16 %v715_v58, %v714_v57 }
 0x72b   : > { %1160 = vrot.lane.b32.xlu1 %v1159_v60, %s1278_s13  ;;  %1155 = vrot.lane.b32.xlu0 %v1159_v60, %s1279_s21  ;;  %s1203_s13 = sshll.u32 %s1280_s28, 4  ;;  %s1204_s13 = int_to_ptr.vmem [resolvable:$false] %s1203_s13 }
 0x72c   : > { %s1205_s21 = scalar_lea.vmem %s1204_s13, 512  ;;  %p1206_p2 = scmp.lt.s32.totalorder %s1575_s14, %s1204_s13 }
 0x72d   : > { %p1207_p3 = scmp.lt.s32.totalorder %s1205_s21, %s1199_s15 }
 0x72f   : > { %p1208_p4 = por %p1207_p3, %p1206_p2 }
 0x731   : > { %p1209_p7 = pnand %p1208_p4, %p1202_p12 }
 0x79d   : > { %v1156_v61 = vpop.permute.xlu0 %1155  ;;  %v1161_v2 = vpop.permute.xlu1 %1160 }
 0x79e   : > { %v1158_v62 = vunpack.i.h.bf16 %v1156_v61  ;;  %v1157_v63 = vunpack.i.l.bf16 %v1156_v61  ;;  %v1163_v3 = vunpack.i.h.bf16 %v1161_v2  ;;  %v1162_v4 = vunpack.i.l.bf16 %v1161_v2 }
 0x7a0   : > { %v941_v1 = vpack.c.bf16 %v1158_v62, %v1157_v63  ;;  %v944_v6 = vpack.c.bf16 %v1163_v3, %v1162_v4 }
 0x7a2   : > { %1039 = vmatpush3.bf16.msk.msra.mxu1 %vm1533_vm0, %v941_v1 }
 0x7a3   : > { %1040 = vmatprep.subr.bf16.mxu1 %v1270_v0 }
 0x7a6   : > { %1041 = vmatpush3.bf16.msra.mxu1 %v729_v59 }
 0x7a7   : > { %1042 = vmatprep.subr.bf16.mxu1 %v1270_v0 }
 0x7aa   : > { %1043 = vmatpush3.bf16.msk.msra.mxu1 %vm1544_vm2, %v944_v6 }
 0x7ab   : > { %1044 = vmatprep.subr.bf16.mxu1 %v1270_v0 }
 0x7ae   : > { %1045 = vmatpush3.bf16.msk.msra.mxu1 %vm1452_vm9, %v1448_v36 }
 0x7b1   : > { %1047 = vmatmul.mubr.msk.bf16.vlgmr.msra.gmra.mrb[8].mxu1 %vm425_vm10, %v1170_v7 }
 0x884   : > { %v775_v8 = vpop.f32.mrb[8].mxu1 }
 0x885   : > { %v782_v9 = vmul.f32 0.01, %v775_v8  ;;  %v1048_v10 = vpop.f32.mrb[9].mxu1 }
 0x886   : > { %v778_v11 = vpop.f32.mrb[10].mxu1 }
 0x887   : > { %v784_v12 = vmax.f32 %v775_v8, %v782_v9  ;;  %v783_v13 = vmul.f32 0.01, %v778_v11  ;;  %v1049_v0 = vpop.f32.mrb[11].mxu1 }
 0x889   : > { %v786_v14 = vadd.f32 %v784_v12, %v1524_v35  ;;  %v785_v15 = vmax.f32 %v778_v11, %v783_v13 }
 0x88b   : > { %v788_v16 = vmul.f32 0.01, %v786_v14  ;;  %v787_v36 = vadd.f32 %v785_v15, %v1526_v38 }
 0x88d   : > { %v790_v37 = vmax.f32 %v786_v14, %v788_v16  ;;  %v789_v17 = vmul.f32 0.01, %v787_v36 }
 0x88f   : > { %792 = vst [vmem:[%s284_s9] sm:$0xff] %v790_v37  ;;  %v791_v18 = vmax.f32 %v787_v36, %v789_v17 }
 0x891   : > { %793 = vst [vmem:[%s284_s9 + $0x8] sm:$0xff] %v791_v18 }
 0x892   : > { %1212 = shalt.err (!%p1209_p7)
}
 0x893   : > { %s1213_s22 = scalar_lea.hbm %s1580_s19, 256  ;;  %s1217_s8 = scalar_lea.hbm %s1630_s7, 1024 }
 0x894   : > { %p1214_p8 = scmp.ne.s32.totalorder %s1580_s19, %s1213_s22  ;;  %p1218_p1 = scmp.lt.u32.totalorder %s1580_s19, %s1630_s7 }
 0x895   : > { %p1219_p0 = scmp.lt.u32.totalorder %s1217_s8, %s1213_s22  ;;  %p1221_p6 = scmp.lt.u32.totalorder %s1213_s22, %s1580_s19 }
 0x896   : > { %p1215_p11 = pnand %p1214_p8, %p1651_p9 }
 0x897   : > { %p1220_p5 = por %p1219_p0, %p1218_p1 }
 0x898   : > { %p1216_p13 = pneg %p1215_p11 }
 0x899   : > { %p1222_p10 = por %p1221_p6, %p1220_p5 }
 0x89b   : > { %p1223_p12 = pnand %p1222_p10, %p1216_p13 }
 0x89d   : > { %1226 = shalt.err (!%p1223_p12)
}
 0x89e   : > { %s1281_s16 = smov 128   ;;  %s1282_s18 = smov 8  }
 0x89f   : > { %1054 = dma.vmem_to_hbm [thread:$0]  (%p1651_p9), %s1575_s14, 256, %s1580_s19, %s1582_s20, %s1281_s16, %s1281_s16, %s1282_s18  }
 0x8a0 PF: > { %p1066_p2 = scmp.ge.s32.totalorder %s1265_s27, 2  ;;  %s823_s15 = sand.u32 1, %s1253_s24  }
 0x8a1   : > { %p1652_p3 = scmp.ne.s32.totalorder %s1635_s12, 0  ;;  %s824_s28 = scalar_lea.sflag [#allocation4], %s823_s15 }
 0x8a3   : > { %p1061_p4 = pnand %p1066_p2, %p1652_p3 }
 0x8a5   : > { %1248 = dma.done.wait (!%p1061_p4), %s824_s28, 256  }
 0x8a6   : > { %1250 = vsyncadd (!%p1061_p4), %s824_s28, 4294967040  ;;  %p18_p7 = scmp.ge.s32.totalorder %s1348_s30, 6   ;;  %s1653_s24 = smov %s1257_s25 }
 0x8a7   : > { %s1654_s25 = smov %s1261_s26  ;;  %s1655_s26 = smov %s1359_s10 }
 0x8a8   : > { %s1656_s27 = smov %s1348_s30  ;;  %20 = sbr.rel (!%p18_p7) target bundleno = 4 (0x4), region = 88 }
 0x8af   :  { %829 = vsyncpa [#allocation3], 1 }
 0x8b0   :  { %831 = vsyncpa [#allocation3 + $0x1], 1 }
 0x8b1   :  { %832 = vsyncpa [#allocation4], 1 }
 0x8b2   :  { %834 = vsyncpa [#allocation4 + $0x1], 1 }

</bundles_post_ra>
